<compile_context>
chip_gen: v6e
topology: v6e:2x2x1
jax: 0.10.0
libtpu: 0.0.40
codegen_flags: <defaults>
</compile_context>

<pallas_src>
import jax
import jax.numpy as jnp
from jax.experimental import pallas as pl
from jax.experimental.pallas import tpu as pltpu

# ---- static hyper-parameters (closed over by the kernel) --------------------
DT = 10.0
TAU_LO = 20.0
TAU_HI = 100.0

T = 8        # sequence length (fully unrolled inside the kernel)
B = 2        # batch size
N_INP = 8    # n_inp
N_REC = 128  # n_rec (lane-aligned)
N_OUT = 8    # n_out


# -----------------------------------------------------------------------------
# Single fused kernel: parameter prologue + drive precompute + unrolled
# recurrence + batched readout.  No grid; everything VMEM-resident.
# -----------------------------------------------------------------------------
def rnn_fused_kernel(inp_flat_ref, noise_flat_ref, x0_ref,
                     w_inp_ref, w_rec_t_ref, dale_t_ref, w_out_ref,
                     taus_ref, winp_scale_ref, wout_scale_ref,
                     x_hist_ref, y_hist_ref):
    # ---------------- prologue: parameter-only math, once per launch ----------
    # w_eff.T = (relu(w_rec) @ dale).T = dale.T @ relu(w_rec.T).  The raw
    # transposes were done in the wrapper, so the stationary recurrent operand
    # is produced directly in its native [K, N] feed order — no per-step
    # transpose / relayout ever happens.
    w_eff_t = jnp.dot(dale_t_ref[...], jnp.maximum(w_rec_t_ref[...], 0.0),
                      preferred_element_type=jnp.float32)            # [N_REC, N_REC]

    # project_taus + leak coefficients (time-invariant).
    taus_sig = jax.nn.sigmoid(taus_ref[...]) * (TAU_HI - TAU_LO) + TAU_LO
    alpha = DT / taus_sig                                            # [1, N_REC]
    one_m_alpha = 1.0 - alpha
    noise_scale = jnp.sqrt(2.0 * alpha)

    # Fold the per-column output scale into w_out (out_nonlinearity = identity).
    w_out_eff = w_out_ref[...] * wout_scale_ref[...]                 # [N_REC, N_OUT]

    # Per-step drive, precomputed as ONE batched matmul + one elementwise pass:
    #   drive[t] = alpha * w_inp_scale * (inp[t] @ w_inp) + sqrt(2*alpha) * noise[t]
    inp_proj = jnp.dot(inp_flat_ref[...], w_inp_ref[...],
                       preferred_element_type=jnp.float32)           # [T*B, N_REC]
    drive = ((alpha * winp_scale_ref[0, 0]) * inp_proj
             + noise_scale * noise_flat_ref[...])                    # [T*B, N_REC]

    # ---------------- unrolled recurrence: hidden state stays in vregs --------
    # TODO(synk): for larger T / bf16 weights, hold w_eff_t in the MXU staging
    # registers across steps via pltpu.matmul_push_rhs / matmul_acc_lhs /
    # matmul_pop; skipped here to keep f32 parity and simple lowering.
    x = x0_ref[...]                                                  # [B, N_REC]
    for t in range(T):                                               # static unroll (T = 8)
        rec = jnp.dot(jnp.tanh(x), w_eff_t,
                      preferred_element_type=jnp.float32)            # [B, N_REC]
        x = one_m_alpha * x + alpha * rec + drive[t * B:(t + 1) * B, :]
        x_hist_ref[pl.ds(t * B, B), :] = x                           # VMEM-resident output

    # ---------------- batched readout: one [T*B, N_REC] @ [N_REC, N_OUT] ------
    y_hist_ref[...] = jnp.dot(x_hist_ref[...], w_out_eff,
                              preferred_element_type=jnp.float32)


# -----------------------------------------------------------------------------
# Wrapper
# -----------------------------------------------------------------------------
@jax.jit
def rnn_cell_sequence(inp_seq, x0, noise_seq, w_inp, w_rec, dale_mask, w_out,
                      taus_gaus, w_inp_scale, w_out_scale):
    vmem = pl.BlockSpec(memory_space=pltpu.MemorySpace.VMEM)
    smem = pl.BlockSpec(memory_space=pltpu.MemorySpace.SMEM)

    # One-time layout plumbing outside the kernel (cheap XLA ops): pre-transpose
    # the recurrent weight / mask and flatten the time axis so the kernel body
    # is a pure unrolled recurrence over VMEM-resident operands.
    w_rec_t = w_rec.T                                  # [N_REC, N_REC]
    dale_t = dale_mask.T                               # [N_REC, N_REC]
    inp_flat = inp_seq.reshape(T * B, N_INP)           # [T*B, N_INP]
    noise_flat = noise_seq.reshape(T * B, N_REC)       # [T*B, N_REC]

    x_flat, y_flat = pl.pallas_call(
        rnn_fused_kernel,
        out_shape=(jax.ShapeDtypeStruct((T * B, N_REC), jnp.float32),
                   jax.ShapeDtypeStruct((T * B, N_OUT), jnp.float32)),
        in_specs=[vmem, vmem, vmem,          # inp_flat, noise_flat, x0
                  vmem, vmem, vmem, vmem,    # w_inp, w_rec_t, dale_t, w_out
                  vmem, smem, vmem],         # taus_gaus, w_inp_scale (scalar), w_out_scale
        out_specs=(vmem, vmem),
    )(inp_flat, noise_flat, x0, w_inp, w_rec_t, dale_t, w_out,
      taus_gaus, w_inp_scale, w_out_scale)

    return x_flat.reshape(T, B, N_REC), y_flat.reshape(T, B, N_OUT)


# -----------------------------------------------------------------------------
# Pure-JAX reference (mirrors the PyTorch forward, step by step)
# -----------------------------------------------------------------------------
def reference_sequence(inp_seq, x0, noise_seq, w_inp, w_rec, dale_mask, w_out,
                       taus_gaus, w_inp_scale, w_out_scale):
    w_eff = jnp.maximum(w_rec, 0.0) @ dale_mask
    taus_sig = jax.nn.sigmoid(taus_gaus) * (TAU_HI - TAU_LO) + TAU_LO
    alpha = DT / taus_sig
    x = x0
    xs, ys = [], []
    for t in range(T):
        noise_t = jnp.sqrt(2.0 * alpha) * noise_seq[t]
        rec_input = jnp.tanh(x) @ w_eff.T + w_inp_scale[0, 0] * (inp_seq[t] @ w_inp)
        x = (1.0 - alpha) * x + alpha * rec_input + noise_t
        ys.append(w_out_scale * (x @ w_out))
        xs.append(x)
    return jnp.stack(xs), jnp.stack(ys)


if __name__ == "__main__":
    key = jax.random.PRNGKey(0)
    keys = jax.random.split(key, 8)

    # ---- deterministic parameter init (shapes from __init__) ----------------
    w_inp = jax.random.normal(keys[0], (N_INP, N_REC), jnp.float32) / jnp.sqrt(N_INP)
    w_rec = jax.random.normal(keys[1], (N_REC, N_REC), jnp.float32) / jnp.sqrt(N_REC)
    n_exc = int(0.8 * N_REC)
    dale_diag = jnp.concatenate([jnp.ones((n_exc,)), -jnp.ones((N_REC - n_exc,))])
    dale_mask = jnp.diag(dale_diag).astype(jnp.float32)
    w_out = jax.random.normal(keys[2], (N_REC, N_OUT), jnp.float32) / jnp.sqrt(N_REC)
    taus_gaus = jax.random.normal(keys[3], (1, N_REC), jnp.float32)
    w_inp_scale = jnp.full((1, 1), 1.5, jnp.float32)                        # scale_w_inp
    w_out_scale = (0.5 + 0.1 * jnp.arange(N_OUT, dtype=jnp.float32))[None]  # scale_w_out

    # ---- example sequence inputs --------------------------------------------
    inp_seq = jax.random.normal(keys[4], (T, B, N_INP), jnp.float32)
    x0 = jax.random.normal(keys[5], (B, N_REC), jnp.float32)
    noise_seq = jax.random.normal(keys[6], (T, B, N_REC), jnp.float32)

    x_hist, y_hist = rnn_cell_sequence(inp_seq, x0, noise_seq, w_inp, w_rec,
                                       dale_mask, w_out, taus_gaus,
                                       w_inp_scale, w_out_scale)
    jax.block_until_ready((x_hist, y_hist))

    # correctness check against pure-JAX reference (all T steps)
    x_ref, y_ref = reference_sequence(inp_seq, x0, noise_seq, w_inp, w_rec,
                                      dale_mask, w_out, taus_gaus,
                                      w_inp_scale, w_out_scale)
    assert jnp.allclose(x_hist, x_ref, atol=1e-3, rtol=1e-3), "x mismatch"
    assert jnp.allclose(y_hist, y_ref, atol=1e-3, rtol=1e-3), "output mismatch"

    print("KERNEL_OK")
</pallas_src>

<mosaic_0001>
module attributes {stable_mosaic.version = 11 : i64} {
  func.func @rnn_fused_kernel(%arg0: memref<16x8xf32, #tpu.memory_space<vmem>>, %arg1: memref<16x128xf32, #tpu.memory_space<vmem>>, %arg2: memref<2x128xf32, #tpu.memory_space<vmem>>, %arg3: memref<8x128xf32, #tpu.memory_space<vmem>>, %arg4: memref<128x128xf32, #tpu.memory_space<vmem>>, %arg5: memref<128x128xf32, #tpu.memory_space<vmem>>, %arg6: memref<128x8xf32, #tpu.memory_space<vmem>>, %arg7: memref<1x128xf32, #tpu.memory_space<vmem>>, %arg8: memref<1x1xf32, #tpu.memory_space<smem>>, %arg9: memref<1x8xf32, #tpu.memory_space<vmem>>, %arg10: memref<16x128xf32, #tpu.memory_space<vmem>>, %arg11: memref<16x8xf32, #tpu.memory_space<vmem>>) attributes {dimension_semantics = [], scalar_prefetch = 0 : i64, scratch_operands = 0 : i64, tpu.core_type = #tpu.core_type<tc>} {
    %c0 = arith.constant 0 : index
    %c0_0 = arith.constant 0 : index
    %0 = vector.load %arg5[%c0, %c0_0] : memref<128x128xf32, #tpu.memory_space<vmem>>, vector<128x128xf32>
    %c0_1 = arith.constant 0 : index
    %c0_2 = arith.constant 0 : index
    %1 = vector.load %arg4[%c0_1, %c0_2] : memref<128x128xf32, #tpu.memory_space<vmem>>, vector<128x128xf32>
    %cst = arith.constant 0.000000e+00 : f32
    %2 = vector.broadcast %cst : f32 to vector<128x128xf32>
    %3 = arith.maximumf %1, %2 : vector<128x128xf32>
    %cst_3 = arith.constant dense<0.000000e+00> : vector<128x128xf32>
    %4 = tpu.matmul %0, %3, %cst_3 {dimension_numbers = #tpu.dot_dimension_numbers<[1], [0], [0], [1], [0, 0, 1, 1], [], []>} : vector<128x128xf32>, vector<128x128xf32>, vector<128x128xf32> -> vector<128x128xf32>
    %c0_4 = arith.constant 0 : index
    %c0_5 = arith.constant 0 : index
    %5 = vector.load %arg7[%c0_4, %c0_5] : memref<1x128xf32, #tpu.memory_space<vmem>>, vector<1x128xf32>
    %6 = arith.negf %5 : vector<1x128xf32>
    %7 = math.exp %6 : vector<1x128xf32>
    %cst_6 = arith.constant 1.000000e+00 : f32
    %8 = vector.broadcast %cst_6 : f32 to vector<1x128xf32>
    %9 = arith.addf %8, %7 : vector<1x128xf32>
    %10 = arith.divf %8, %9 : vector<1x128xf32>
    %cst_7 = arith.constant 8.000000e+01 : f32
    %11 = vector.broadcast %cst_7 : f32 to vector<1x128xf32>
    %12 = arith.mulf %10, %11 : vector<1x128xf32>
    %cst_8 = arith.constant 2.000000e+01 : f32
    %13 = vector.broadcast %cst_8 : f32 to vector<1x128xf32>
    %14 = arith.addf %12, %13 : vector<1x128xf32>
    %cst_9 = arith.constant 1.000000e+01 : f32
    %15 = vector.broadcast %cst_9 : f32 to vector<1x128xf32>
    %16 = arith.divf %15, %14 : vector<1x128xf32>
    %cst_10 = arith.constant 1.000000e+00 : f32
    %17 = vector.broadcast %cst_10 : f32 to vector<1x128xf32>
    %18 = arith.subf %17, %16 : vector<1x128xf32>
    %cst_11 = arith.constant 2.000000e+00 : f32
    %19 = vector.broadcast %cst_11 : f32 to vector<1x128xf32>
    %20 = arith.mulf %19, %16 : vector<1x128xf32>
    %21 = math.sqrt %20 : vector<1x128xf32>
    %c0_12 = arith.constant 0 : index
    %c0_13 = arith.constant 0 : index
    %22 = vector.load %arg6[%c0_12, %c0_13] : memref<128x8xf32, #tpu.memory_space<vmem>>, vector<128x8xf32>
    %c0_14 = arith.constant 0 : index
    %c0_15 = arith.constant 0 : index
    %23 = vector.load %arg9[%c0_14, %c0_15] : memref<1x8xf32, #tpu.memory_space<vmem>>, vector<1x8xf32>
    %24 = vector.broadcast %23 : vector<1x8xf32> to vector<128x8xf32>
    %25 = arith.mulf %22, %24 : vector<128x8xf32>
    %c0_16 = arith.constant 0 : index
    %c0_17 = arith.constant 0 : index
    %26 = vector.load %arg0[%c0_16, %c0_17] : memref<16x8xf32, #tpu.memory_space<vmem>>, vector<16x8xf32>
    %c0_18 = arith.constant 0 : index
    %c0_19 = arith.constant 0 : index
    %27 = vector.load %arg3[%c0_18, %c0_19] : memref<8x128xf32, #tpu.memory_space<vmem>>, vector<8x128xf32>
    %cst_20 = arith.constant dense<0.000000e+00> : vector<16x128xf32>
    %28 = tpu.matmul %26, %27, %cst_20 {dimension_numbers = #tpu.dot_dimension_numbers<[1], [0], [0], [1], [0, 0, 1, 1], [], []>} : vector<16x8xf32>, vector<8x128xf32>, vector<16x128xf32> -> vector<16x128xf32>
    %c0_21 = arith.constant 0 : index
    %c0_22 = arith.constant 0 : index
    %29 = memref.load %arg8[%c0_21, %c0_22] : memref<1x1xf32, #tpu.memory_space<smem>>
    %30 = vector.broadcast %29 : f32 to vector<1x128xf32>
    %31 = arith.mulf %16, %30 : vector<1x128xf32>
    %32 = vector.broadcast %31 : vector<1x128xf32> to vector<16x128xf32>
    %33 = arith.mulf %32, %28 : vector<16x128xf32>
    %c0_23 = arith.constant 0 : index
    %c0_24 = arith.constant 0 : index
    %34 = vector.load %arg1[%c0_23, %c0_24] : memref<16x128xf32, #tpu.memory_space<vmem>>, vector<16x128xf32>
    %35 = vector.broadcast %21 : vector<1x128xf32> to vector<16x128xf32>
    %36 = arith.mulf %35, %34 : vector<16x128xf32>
    %37 = arith.addf %33, %36 : vector<16x128xf32>
    %c0_25 = arith.constant 0 : index
    %c0_26 = arith.constant 0 : index
    %38 = vector.load %arg2[%c0_25, %c0_26] : memref<2x128xf32, #tpu.memory_space<vmem>>, vector<2x128xf32>
    %39 = math.tanh %38 : vector<2x128xf32>
    %cst_27 = arith.constant dense<0.000000e+00> : vector<2x128xf32>
    %40 = tpu.matmul %39, %4, %cst_27 {dimension_numbers = #tpu.dot_dimension_numbers<[1], [0], [0], [1], [0, 0, 1, 1], [], []>} : vector<2x128xf32>, vector<128x128xf32>, vector<2x128xf32> -> vector<2x128xf32>
    %41 = vector.broadcast %18 : vector<1x128xf32> to vector<2x128xf32>
    %42 = arith.mulf %41, %38 : vector<2x128xf32>
    %43 = vector.broadcast %16 : vector<1x128xf32> to vector<2x128xf32>
    %44 = arith.mulf %43, %40 : vector<2x128xf32>
    %45 = arith.addf %42, %44 : vector<2x128xf32>
    %46 = vector.extract_strided_slice %37 {offsets = [0, 0], sizes = [2, 128], strides = [1, 1]} : vector<16x128xf32> to vector<2x128xf32>
    %47 = arith.addf %45, %46 : vector<2x128xf32>
    %c0_28 = arith.constant 0 : index
    %c0_29 = arith.constant 0 : index
    %48 = vector.load %arg10[%c0_28, %c0_29] : memref<16x128xf32, #tpu.memory_space<vmem>>, vector<2x128xf32>
    tpu.vector_store %arg10[%c0_28, %c0_29], %47 {strides = array<i32>} : memref<16x128xf32, #tpu.memory_space<vmem>>, vector<2x128xf32>,
    %49 = math.tanh %47 : vector<2x128xf32>
    %cst_30 = arith.constant dense<0.000000e+00> : vector<2x128xf32>
    %50 = tpu.matmul %49, %4, %cst_30 {dimension_numbers = #tpu.dot_dimension_numbers<[1], [0], [0], [1], [0, 0, 1, 1], [], []>} : vector<2x128xf32>, vector<128x128xf32>, vector<2x128xf32> -> vector<2x128xf32>
    %51 = vector.broadcast %18 : vector<1x128xf32> to vector<2x128xf32>
    %52 = arith.mulf %51, %47 : vector<2x128xf32>
    %53 = vector.broadcast %16 : vector<1x128xf32> to vector<2x128xf32>
    %54 = arith.mulf %53, %50 : vector<2x128xf32>
    %55 = arith.addf %52, %54 : vector<2x128xf32>
    %56 = vector.extract_strided_slice %37 {offsets = [2, 0], sizes = [2, 128], strides = [1, 1]} : vector<16x128xf32> to vector<2x128xf32>
    %57 = arith.addf %55, %56 : vector<2x128xf32>
    %c2 = arith.constant 2 : index
    %c0_31 = arith.constant 0 : index
    %58 = vector.load %arg10[%c2, %c0_31] : memref<16x128xf32, #tpu.memory_space<vmem>>, vector<2x128xf32>
    tpu.vector_store %arg10[%c2, %c0_31], %57 {strides = array<i32>} : memref<16x128xf32, #tpu.memory_space<vmem>>, vector<2x128xf32>,
    %59 = math.tanh %57 : vector<2x128xf32>
    %cst_32 = arith.constant dense<0.000000e+00> : vector<2x128xf32>
    %60 = tpu.matmul %59, %4, %cst_32 {dimension_numbers = #tpu.dot_dimension_numbers<[1], [0], [0], [1], [0, 0, 1, 1], [], []>} : vector<2x128xf32>, vector<128x128xf32>, vector<2x128xf32> -> vector<2x128xf32>
    %61 = vector.broadcast %18 : vector<1x128xf32> to vector<2x128xf32>
    %62 = arith.mulf %61, %57 : vector<2x128xf32>
    %63 = vector.broadcast %16 : vector<1x128xf32> to vector<2x128xf32>
    %64 = arith.mulf %63, %60 : vector<2x128xf32>
    %65 = arith.addf %62, %64 : vector<2x128xf32>
    %66 = vector.extract_strided_slice %37 {offsets = [4, 0], sizes = [2, 128], strides = [1, 1]} : vector<16x128xf32> to vector<2x128xf32>
    %67 = arith.addf %65, %66 : vector<2x128xf32>
    %c4 = arith.constant 4 : index
    %c0_33 = arith.constant 0 : index
    %68 = vector.load %arg10[%c4, %c0_33] : memref<16x128xf32, #tpu.memory_space<vmem>>, vector<2x128xf32>
    tpu.vector_store %arg10[%c4, %c0_33], %67 {strides = array<i32>} : memref<16x128xf32, #tpu.memory_space<vmem>>, vector<2x128xf32>,
    %69 = math.tanh %67 : vector<2x128xf32>
    %cst_34 = arith.constant dense<0.000000e+00> : vector<2x128xf32>
    %70 = tpu.matmul %69, %4, %cst_34 {dimension_numbers = #tpu.dot_dimension_numbers<[1], [0], [0], [1], [0, 0, 1, 1], [], []>} : vector<2x128xf32>, vector<128x128xf32>, vector<2x128xf32> -> vector<2x128xf32>
    %71 = vector.broadcast %18 : vector<1x128xf32> to vector<2x128xf32>
    %72 = arith.mulf %71, %67 : vector<2x128xf32>
    %73 = vector.broadcast %16 : vector<1x128xf32> to vector<2x128xf32>
    %74 = arith.mulf %73, %70 : vector<2x128xf32>
    %75 = arith.addf %72, %74 : vector<2x128xf32>
    %76 = vector.extract_strided_slice %37 {offsets = [6, 0], sizes = [2, 128], strides = [1, 1]} : vector<16x128xf32> to vector<2x128xf32>
    %77 = arith.addf %75, %76 : vector<2x128xf32>
    %c6 = arith.constant 6 : index
    %c0_35 = arith.constant 0 : index
    %78 = vector.load %arg10[%c6, %c0_35] : memref<16x128xf32, #tpu.memory_space<vmem>>, vector<2x128xf32>
    tpu.vector_store %arg10[%c6, %c0_35], %77 {strides = array<i32>} : memref<16x128xf32, #tpu.memory_space<vmem>>, vector<2x128xf32>,
    %79 = math.tanh %77 : vector<2x128xf32>
    %cst_36 = arith.constant dense<0.000000e+00> : vector<2x128xf32>
    %80 = tpu.matmul %79, %4, %cst_36 {dimension_numbers = #tpu.dot_dimension_numbers<[1], [0], [0], [1], [0, 0, 1, 1], [], []>} : vector<2x128xf32>, vector<128x128xf32>, vector<2x128xf32> -> vector<2x128xf32>
    %81 = vector.broadcast %18 : vector<1x128xf32> to vector<2x128xf32>
    %82 = arith.mulf %81, %77 : vector<2x128xf32>
    %83 = vector.broadcast %16 : vector<1x128xf32> to vector<2x128xf32>
    %84 = arith.mulf %83, %80 : vector<2x128xf32>
    %85 = arith.addf %82, %84 : vector<2x128xf32>
    %86 = vector.extract_strided_slice %37 {offsets = [8, 0], sizes = [2, 128], strides = [1, 1]} : vector<16x128xf32> to vector<2x128xf32>
    %87 = arith.addf %85, %86 : vector<2x128xf32>
    %c8 = arith.constant 8 : index
    %c0_37 = arith.constant 0 : index
    %88 = vector.load %arg10[%c8, %c0_37] : memref<16x128xf32, #tpu.memory_space<vmem>>, vector<2x128xf32>
    tpu.vector_store %arg10[%c8, %c0_37], %87 {strides = array<i32>} : memref<16x128xf32, #tpu.memory_space<vmem>>, vector<2x128xf32>,
    %89 = math.tanh %87 : vector<2x128xf32>
    %cst_38 = arith.constant dense<0.000000e+00> : vector<2x128xf32>
    %90 = tpu.matmul %89, %4, %cst_38 {dimension_numbers = #tpu.dot_dimension_numbers<[1], [0], [0], [1], [0, 0, 1, 1], [], []>} : vector<2x128xf32>, vector<128x128xf32>, vector<2x128xf32> -> vector<2x128xf32>
    %91 = vector.broadcast %18 : vector<1x128xf32> to vector<2x128xf32>
    %92 = arith.mulf %91, %87 : vector<2x128xf32>
    %93 = vector.broadcast %16 : vector<1x128xf32> to vector<2x128xf32>
    %94 = arith.mulf %93, %90 : vector<2x128xf32>
    %95 = arith.addf %92, %94 : vector<2x128xf32>
    %96 = vector.extract_strided_slice %37 {offsets = [10, 0], sizes = [2, 128], strides = [1, 1]} : vector<16x128xf32> to vector<2x128xf32>
    %97 = arith.addf %95, %96 : vector<2x128xf32>
    %c10 = arith.constant 10 : index
    %c0_39 = arith.constant 0 : index
    %98 = vector.load %arg10[%c10, %c0_39] : memref<16x128xf32, #tpu.memory_space<vmem>>, vector<2x128xf32>
    tpu.vector_store %arg10[%c10, %c0_39], %97 {strides = array<i32>} : memref<16x128xf32, #tpu.memory_space<vmem>>, vector<2x128xf32>,
    %99 = math.tanh %97 : vector<2x128xf32>
    %cst_40 = arith.constant dense<0.000000e+00> : vector<2x128xf32>
    %100 = tpu.matmul %99, %4, %cst_40 {dimension_numbers = #tpu.dot_dimension_numbers<[1], [0], [0], [1], [0, 0, 1, 1], [], []>} : vector<2x128xf32>, vector<128x128xf32>, vector<2x128xf32> -> vector<2x128xf32>
    %101 = vector.broadcast %18 : vector<1x128xf32> to vector<2x128xf32>
    %102 = arith.mulf %101, %97 : vector<2x128xf32>
    %103 = vector.broadcast %16 : vector<1x128xf32> to vector<2x128xf32>
    %104 = arith.mulf %103, %100 : vector<2x128xf32>
    %105 = arith.addf %102, %104 : vector<2x128xf32>
    %106 = vector.extract_strided_slice %37 {offsets = [12, 0], sizes = [2, 128], strides = [1, 1]} : vector<16x128xf32> to vector<2x128xf32>
    %107 = arith.addf %105, %106 : vector<2x128xf32>
    %c12 = arith.constant 12 : index
    %c0_41 = arith.constant 0 : index
    %108 = vector.load %arg10[%c12, %c0_41] : memref<16x128xf32, #tpu.memory_space<vmem>>, vector<2x128xf32>
    tpu.vector_store %arg10[%c12, %c0_41], %107 {strides = array<i32>} : memref<16x128xf32, #tpu.memory_space<vmem>>, vector<2x128xf32>,
    %109 = math.tanh %107 : vector<2x128xf32>
    %cst_42 = arith.constant dense<0.000000e+00> : vector<2x128xf32>
    %110 = tpu.matmul %109, %4, %cst_42 {dimension_numbers = #tpu.dot_dimension_numbers<[1], [0], [0], [1], [0, 0, 1, 1], [], []>} : vector<2x128xf32>, vector<128x128xf32>, vector<2x128xf32> -> vector<2x128xf32>
    %111 = vector.broadcast %18 : vector<1x128xf32> to vector<2x128xf32>
    %112 = arith.mulf %111, %107 : vector<2x128xf32>
    %113 = vector.broadcast %16 : vector<1x128xf32> to vector<2x128xf32>
    %114 = arith.mulf %113, %110 : vector<2x128xf32>
    %115 = arith.addf %112, %114 : vector<2x128xf32>
    %116 = vector.extract_strided_slice %37 {offsets = [14, 0], sizes = [2, 128], strides = [1, 1]} : vector<16x128xf32> to vector<2x128xf32>
    %117 = arith.addf %115, %116 : vector<2x128xf32>
    %c14 = arith.constant 14 : index
    %c0_43 = arith.constant 0 : index
    %118 = vector.load %arg10[%c14, %c0_43] : memref<16x128xf32, #tpu.memory_space<vmem>>, vector<2x128xf32>
    tpu.vector_store %arg10[%c14, %c0_43], %117 {strides = array<i32>} : memref<16x128xf32, #tpu.memory_space<vmem>>, vector<2x128xf32>,
    %c0_44 = arith.constant 0 : index
    %c0_45 = arith.constant 0 : index
    %119 = vector.load %arg10[%c0_44, %c0_45] : memref<16x128xf32, #tpu.memory_space<vmem>>, vector<16x128xf32>
    %cst_46 = arith.constant dense<0.000000e+00> : vector<16x8xf32>
    %120 = tpu.matmul %119, %25, %cst_46 {dimension_numbers = #tpu.dot_dimension_numbers<[1], [0], [0], [1], [0, 0, 1, 1], [], []>} : vector<16x128xf32>, vector<128x8xf32>, vector<16x8xf32> -> vector<16x8xf32>
    %c0_47 = arith.constant 0 : index
    %c0_48 = arith.constant 0 : index
    %121 = vector.load %arg11[%c0_47, %c0_48] : memref<16x8xf32, #tpu.memory_space<vmem>>, vector<16x8xf32>
    tpu.vector_store %arg11[%c0_47, %c0_48], %120 {strides = array<i32>} : memref<16x8xf32, #tpu.memory_space<vmem>>, vector<16x8xf32>,
    return
  }
}

</mosaic_0001>

<bundles_post_ra>
// kernel: rnn_cell_sequence.1
= control target key start
LH: loop header
LB: loop body
LE: loop exit
PB: predicated region body
PF: predicated region fallthrough
CT: control target
= control target key end

     0   :  { %18 = vsyncpa [#allocation4], 0  ;;  %s2400_s0 = inlined_call_operand.vmem [shape: f32[16,8], index: 0, kind: input, shape index: {}]   ;;  %s2401_s1 = inlined_call_operand.vmem [shape: f32[16,128], index: 1, kind: input, shape index: {}]   ;;  %s2402_s2 = inlined_call_operand.vmem [shape: f32[2,128], index: 2, kind: input, shape index: {}]   ;;  %s2403_s3 = inlined_call_operand.vmem [shape: f32[8,128], index: 3, kind: input, shape index: {}]   ;;  %s2404_s4 = inlined_call_operand.vmem [shape: f32[128,128], index: 4, kind: input, shape index: {}]   ;;  %s2405_s5 = inlined_call_operand.vmem [shape: f32[128,128], index: 5, kind: input, shape index: {}]   ;;  %s2406_s6 = inlined_call_operand.vmem [shape: f32[128,8], index: 6, kind: input, shape index: {}]   ;;  %s2407_s7 = inlined_call_operand.vmem [shape: f32[1,128], index: 7, kind: input, shape index: {}]   ;;  %s2408_s8 = inlined_call_operand.<no memory space> [shape: f32[1,1], index: 8, kind: input, shape index: {}]   ;;  %s2409_s9 = inlined_call_operand.vmem [shape: f32[1,8], index: 9, kind: input, shape index: {}]   ;;  %s2410_s10 = inlined_call_operand.hbm [shape: f32[16,128], index: 10, kind: output, shape index: {0}]   ;;  %s2411_s11 = inlined_call_operand.hbm [shape: f32[16,8], index: 11, kind: output, shape index: {1}]  }
   0x1   :  { %v71_v0 = vld [vmem:[%s2404_s4 + $0x78] sm:$0xff]  ;;  %v70_v1 = vld [vmem:[%s2404_s4 + $0x70] sm:$0xff]  ;;  %v69_v2 = vld [vmem:[%s2404_s4 + $0x68] sm:$0xff] }
   0x2   :  { %v87_v3 = vmax.f32 %v71_v0, 0.0  ;;  %v86_v4 = vmax.f32 %v70_v1, 0.0  ;;  %v68_v5 = vld [vmem:[%s2404_s4 + $0x60] sm:$0xff]  ;;  %v85_v6 = vmax.f32 %v69_v2, 0.0  ;;  %v67_v7 = vld [vmem:[%s2404_s4 + $0x58] sm:$0xff]  ;;  %v66_v10 = vld [vmem:[%s2404_s4 + $0x50] sm:$0xff] }
   0x3   :  { %v84_v8 = vmax.f32 %v68_v5, 0.0  ;;  %v40_v9 = vld [vmem:[%s2405_s5] sm:$0xff]  ;;  %v83_v11 = vmax.f32 %v67_v7, 0.0  ;;  %v65_v12 = vld [vmem:[%s2404_s4 + $0x48] sm:$0xff]  ;;  %v82_v13 = vmax.f32 %v66_v10, 0.0 }
   0x4   :  { %1339 = vmatprep.subr.mxu0 %v87_v3  ;;  %1371 = vmatprep.mubr.f32.mxu0 %v40_v9  ;;  %v64_v14 = vld [vmem:[%s2404_s4 + $0x40] sm:$0xff] }
   0x5   :  { %1340 = vmatpush3.msra.mxu0 %v87_v3 }
   0x6   :  { %1341 = vmatprep.subr.mxu0 %v86_v4 }
   0x7   :  { %1342 = vmatpush3.msra.mxu0 %v86_v4 }
   0x8   :  { %1343 = vmatprep.subr.mxu0 %v85_v6 }
   0x9   :  { %1344 = vmatpush3.msra.mxu0 %v85_v6 }
   0xa   :  { %1345 = vmatprep.subr.mxu0 %v84_v8 }
   0xb   :  { %1346 = vmatpush3.msra.mxu0 %v84_v8 }
   0xc   :  { %19 = vsyncpa [#allocation6], 0  ;;  %1347 = vmatprep.subr.mxu0 %v83_v11  ;;  %v81_v15 = vmax.f32 %v65_v12, 0.0  ;;  %v63_v16 = vld [vmem:[%s2404_s4 + $0x38] sm:$0xff]  ;;  %v80_v17 = vmax.f32 %v64_v14, 0.0  ;;  %v62_v18 = vld [vmem:[%s2404_s4 + $0x30] sm:$0xff] }
   0xd   :  { %1348 = vmatpush3.msra.mxu0 %v83_v11  ;;  %v79_v19 = vmax.f32 %v63_v16, 0.0  ;;  %v61_v20 = vld [vmem:[%s2404_s4 + $0x28] sm:$0xff]  ;;  %v78_v21 = vmax.f32 %v62_v18, 0.0  ;;  %v60_v22 = vld [vmem:[%s2404_s4 + $0x20] sm:$0xff]  ;;  %v59_v24 = vld [vmem:[%s2404_s4 + $0x18] sm:$0xff]  ;;  %vm295_vm0 = vcmask 64512  }
   0xe   :  { %1349 = vmatprep.subr.mxu0 %v82_v13  ;;  %v77_v23 = vmax.f32 %v61_v20, 0.0  ;;  %v76_v25 = vmax.f32 %v60_v22, 0.0  ;;  %v58_v26 = vld [vmem:[%s2404_s4 + $0x10] sm:$0xff]  ;;  %v75_v27 = vmax.f32 %v59_v24, 0.0  ;;  %v57_v28 = vld [vmem:[%s2404_s4 + $0x8] sm:$0xff]  ;;  %v56_v30 = vld [vmem:[%s2404_s4] sm:$0xff]  ;;  %v378_v22 = vstv %s2408_s8 }
   0xf   :  { %1350 = vmatpush3.msra.mxu0 %v82_v13  ;;  %v74_v29 = vmax.f32 %v58_v26, 0.0  ;;  %v73_v31 = vmax.f32 %v57_v28, 0.0  ;;  %v72_v32 = vmax.f32 %v56_v30, 0.0  ;;  %v41_v33 = vld [vmem:[%s2405_s5 + $0x8] sm:$0xff]  ;;  %v42_v34 = vld [vmem:[%s2405_s5 + $0x10] sm:$0xff]  ;;  %v43_v35 = vld [vmem:[%s2405_s5 + $0x18] sm:$0xff] }
  0x10   :  { %1351 = vmatprep.subr.mxu0 %v81_v15  ;;  %v44_v36 = vld [vmem:[%s2405_s5 + $0x20] sm:$0xff]  ;;  %v45_v37 = vld [vmem:[%s2405_s5 + $0x28] sm:$0xff]  ;;  %v46_v38 = vld [vmem:[%s2405_s5 + $0x30] sm:$0xff]  ;;  %v1789_v51 = vmov 0.0   ;;  %vm1790_vm1 = vmmov 0  }
  0x11   :  { %1352 = vmatpush3.msra.mxu0 %v81_v15  ;;  %v47_v39 = vld [vmem:[%s2405_s5 + $0x38] sm:$0xff]  ;;  %v48_v40 = vld [vmem:[%s2405_s5 + $0x40] sm:$0xff]  ;;  %v49_v41 = vld [vmem:[%s2405_s5 + $0x48] sm:$0xff] }
  0x12   :  { %1353 = vmatprep.subr.mxu0 %v80_v17  ;;  %v50_v42 = vld [vmem:[%s2405_s5 + $0x50] sm:$0xff]  ;;  %v51_v43 = vld [vmem:[%s2405_s5 + $0x58] sm:$0xff]  ;;  %v52_v44 = vld [vmem:[%s2405_s5 + $0x60] sm:$0xff] }
  0x13   :  { %1354 = vmatpush3.msra.mxu0 %v80_v17  ;;  %v53_v45 = vld [vmem:[%s2405_s5 + $0x68] sm:$0xff]  ;;  %v54_v46 = vld [vmem:[%s2405_s5 + $0x70] sm:$0xff]  ;;  %v55_v47 = vld [vmem:[%s2405_s5 + $0x78] sm:$0xff]  ;;  %v381_v17 = vlaneseq }
  0x14   :  { %1355 = vmatprep.subr.mxu0 %v79_v19  ;;  %v294_v48 = vld [vmem:[%s2403_s3] sm:$0xff]  ;;  %v293_v50 = vld [vmem:[%s2400_s0 + $0x8] sm:$0xff] }
  0x15   :  { %1356 = vmatpush3.msra.mxu0 %v79_v19  ;;  %1395 = vmatprep.subr.mxu1 %v294_v48  ;;  %v292_v49 = vld [vmem:[%s2400_s0] sm:$0xff]  ;;  %v382_v19 = vshrl.u32 %v381_v17, 7 }
  0x16   :  { %1357 = vmatprep.subr.mxu0 %v78_v21  ;;  %1396 = vmatpush3.msra.mxu1 %v294_v48  ;;  %v233_v52 = vld [vmem:[%s2407_s7] sm:$0x1] }
  0x17   :  { %1358 = vmatpush3.msra.mxu0 %v78_v21  ;;  %1397 = vmatprep.mubr.msk.f32.mxu1 %vm295_vm0, %v292_v49  ;;  %v1146_v53 = vmul.f32 -1.442695, %v233_v52  ;;  %v2032_v11 = vld [vmem:[%s2402_s2] sm:$0x3] }
  0x18   :  { %1359 = vmatprep.subr.mxu0 %v77_v23  ;;  %1398 = vmatmul.mubr.msk.f32.vlgmr.msra.gmra.mxu1 %vm295_vm0, %v293_v50 }
  0x19   :  { %1360 = vmatpush3.msra.mxu0 %v77_v23  ;;  %1400 = vmatprep.subr.mxu1 %v1789_v51  ;;  %1721 = vpow2.f32 %v1146_v53  ;;  %v383_v23 = vsub.s32 0, %v382_v19 }
  0x1a   :  { %1361 = vmatprep.subr.mxu0 %v76_v25  ;;  %1432 = vmatprep.mubr.msk.f32.mxu1 %vm1790_vm1, %v1789_v51 }
  0x1b   :  { %1362 = vmatpush3.msra.mxu0 %v76_v25 }
  0x1c   :  { %1363 = vmatprep.subr.mxu0 %v75_v27 }
  0x1d   :  { %1364 = vmatpush3.msra.mxu0 %v75_v27  ;;  %v389_v27 = vld [vmem:[%s2401_s1 + $0x8] sm:$0xff] }
  0x1e   :  { %1365 = vmatprep.subr.mxu0 %v74_v29 }
  0x1f   :  { %1366 = vmatpush3.msra.mxu0 %v74_v29 }
  0x20   :  { %1367 = vmatprep.subr.mxu0 %v73_v31 }
  0x21   :  { %1368 = vmatpush3.msra.mxu0 %v73_v31 }
  0x22   :  { %1369 = vmatprep.subr.mxu0 %v72_v32 }
  0x23   :  { %1370 = vmatpush3.msra.mxu0 %v72_v32 }
  0x24   :  { %1372 = vmatmul.mubr.f32.vlgmr.msra.gmra.mxu0 %v41_v33  ;;  %1435 = vmatprep.subr.mxu0 %v1789_v51 }
  0x25   :  { %1374 = vmatprep.mubr.f32.mxu0 %v42_v34 }
  0x26   :  { %v1722_v57 = vpop.eup %1721 }
  0x27   :  { %v237_v60 = vadd.f32 1.0, %v1722_v57 }
  0x28   :  { %1375 = vmatmul.mubr.f32.gmra.mxu0 %v43_v35 }
  0x29   :  { %1377 = vmatprep.mubr.f32.mxu0 %v44_v36  ;;  %1723 = vrcp.f32 %v237_v60  ;;  %v388_v36 = vld [vmem:[%s2401_s1] sm:$0xff] }
  0x2c   :  { %1378 = vmatmul.mubr.f32.gmra.mxu0 %v45_v37 }
  0x2d   :  { %1380 = vmatprep.mubr.f32.mxu0 %v46_v38 }
  0x30   :  { %1381 = vmatmul.mubr.f32.gmra.mxu0 %v47_v39 }
  0x31   :  { %1383 = vmatprep.mubr.f32.mxu0 %v48_v40 }
  0x34   :  { %1384 = vmatmul.mubr.f32.gmra.mxu0 %v49_v41 }
  0x35   :  { %1386 = vmatprep.mubr.f32.mxu0 %v50_v42 }
  0x36   :  { %v1724_v5 = vpop.eup %1723 }
  0x37   :  { %v240_v8 = vmul.f32 80.0, %v1724_v5 }
  0x38   :  { %1387 = vmatmul.mubr.f32.gmra.mxu0 %v51_v43 }
  0x39   :  { %1389 = vmatprep.mubr.f32.mxu0 %v52_v44  ;;  %v241_v10 = vadd.f32 20.0, %v240_v8 }
  0x3b   :  { %1725 = vrcp.f32 %v241_v10 }
  0x3c   :  { %1390 = vmatmul.mubr.f32.gmra.mxu0 %v53_v45  ;;  %1727 = vtanh.f32 %v2032_v11 }
  0x3d   :  { %1392 = vmatprep.mubr.f32.mxu0 %v54_v46 }
  0x40   :  { %1393 = vmatmul.mubr.f32.gmra.mxu0 %v55_v47 }
  0x41   :  { %1467 = vmatprep.mubr.msk.f32.mxu0 %vm1790_vm1, %v1789_v51 }
  0x48   :  { %v1726_v12 = vpop.eup %1725 }
  0x49   :  { %v2057_v13 = vmul.f32 10.0, %v1726_v12  ;;  %v1728_v15 = vpop.eup %1727 }
  0x4b   :  { %v245_v14 = vmul.f32 2.0, %v2057_v13  ;;  %v379_v25 = vmul.f32 %v378_v22, %v2057_v13  ;;  %v244_v33 = vsub.f32 1.0, %v2057_v13  ;;  %v2126_v37 = vrot.slane %v2057_v13, %v383_v23 }
  0x4d   :  { %1729 = vrsqrt.f32 %v245_v14  ;;  %vm248_vm2 = vcmp.eq.f32.partialorder %v245_v14, inf  ;;  %v251_v20 = vand.u32 2147483648, %v245_v14  ;;  %vm250_vm3 = vcmp.eq.f32.partialorder %v245_v14, 0.0 }
  0x4e   :  { %v384_v28 = vrot.slane %v379_v25, %v383_v23  ;;  %v2120_v34 = vrot.slane %v244_v33, %v383_v23  ;;  %v264_v33 = vld [vmem:[%s2406_s6 + $0x58] sm:$0xff] }
  0x50   :  { %v478_v40 = vmul.f32 %v2120_v34, %v2032_v11 }
  0x5a   :  { %v1730_v16 = vpop.eup %1729 }
  0x5b   :  { %v247_v18 = vmul.f32 %v1730_v16, %v245_v14 }
  0x5d   :  { %v249_v21 = vsel %vm248_vm2, %v245_v14, %v247_v18 }
  0x5e   :  { %v252_v24 = vsel %vm250_vm3, %v251_v20, %v249_v21 }
  0x5f   :  { %v394_v26 = vrot.slane %v252_v24, %v383_v23 }
  0x61   :  { %v397_v29 = vmul.f32 %v394_v26, %v389_v27  ;;  %v396_v39 = vmul.f32 %v394_v26, %v388_v36  ;;  %v263_v36 = vld [vmem:[%s2406_s6 + $0x50] sm:$0xff] }
  0xd8   :  { %v1399_v30 = vpop.f32.mrf.mxu1 }
  0xd9   :  { %v387_v31 = vmul.f32 %v1399_v30, %v384_v28 }
  0xda   :  { %v368_v35 = vpop.f32.mrf.mxu1 }
  0xdb   :  { %v2117_v32 = vadd.f32 %v397_v29, %v387_v31  ;;  %v386_v38 = vmul.f32 %v384_v28, %v368_v35 }
  0xdd   :  { %v2131_v44 = vadd.f32 %v396_v39, %v386_v38  ;;  %v262_v39 = vld [vmem:[%s2406_s6 + $0x48] sm:$0xff] }
  0xdf   :  { %v564_v57 = vrot.slane %v2131_v44, 2  ;;  %v642_v14 = vrot.slane %v2131_v44, 4  ;;  %v720_v22 = vrot.slane %v2131_v44, 6 }
  0xe4   :  { %v1971_v54 = vpop.f32.mrf.mxu0 }
  0xe6   :  { %v1973_v55 = vpop.f32.mrf.mxu0 }
  0xe8   :  { %v1975_v56 = vpop.f32.mrf.mxu0 }
  0xea   :  { %v1977_v58 = vpop.f32.mrf.mxu0 }
  0xec   :  { %v1979_v59 = vpop.f32.mrf.mxu0 }
  0xee   :  { %v1981_v61 = vpop.f32.mrf.mxu0 }
  0xf0   :  { %v1983_v62 = vpop.f32.mrf.mxu0 }
  0xf2   :  { %v1985_v63 = vpop.f32.mrf.mxu0 }
  0xf4   :  { %v1987_v0 = vpop.f32.mrf.mxu0 }
  0xf6   :  { %v1989_v1 = vpop.f32.mrf.mxu0 }
  0xf8   :  { %v1991_v2 = vpop.f32.mrf.mxu0 }
  0xfa   :  { %v1993_v3 = vpop.f32.mrf.mxu0 }
  0xfc   :  { %v1995_v4 = vpop.f32.mrf.mxu0 }
  0xfe   :  { %v1997_v6 = vpop.f32.mrf.mxu0 }
 0x100   :  { %v1999_v7 = vpop.f32.mrf.mxu0 }
 0x101   :  { %1401 = vmatpush3.msra.mxu1 %v1999_v7  ;;  %1436 = vmatpush3.msra.mxu0 %v1999_v7 }
 0x102   :  { %v2003_v9 = vpop.f32.mrf.mxu0  ;;  %1402 = vmatprep.subr.mxu1 %v1789_v51  ;;  %1437 = vmatprep.subr.mxu0 %v1789_v51 }
 0x103   :  { %1403 = vmatpush3.msra.mxu1 %v2003_v9  ;;  %1438 = vmatpush3.msra.mxu0 %v2003_v9 }
 0x104   :  { %1404 = vmatprep.subr.mxu1 %v1789_v51  ;;  %1439 = vmatprep.subr.mxu0 %v1789_v51 }
 0x105   :  { %1405 = vmatpush3.msra.mxu1 %v1995_v4  ;;  %1440 = vmatpush3.msra.mxu0 %v1995_v4 }
 0x106   :  { %1406 = vmatprep.subr.mxu1 %v1789_v51  ;;  %1441 = vmatprep.subr.mxu0 %v1789_v51 }
 0x107   :  { %1407 = vmatpush3.msra.mxu1 %v1997_v6  ;;  %1442 = vmatpush3.msra.mxu0 %v1997_v6 }
 0x108   :  { %1408 = vmatprep.subr.mxu1 %v1789_v51  ;;  %1443 = vmatprep.subr.mxu0 %v1789_v51 }
 0x109   :  { %1409 = vmatpush3.msra.mxu1 %v1991_v2  ;;  %1444 = vmatpush3.msra.mxu0 %v1991_v2 }
 0x10a   :  { %1410 = vmatprep.subr.mxu1 %v1789_v51  ;;  %1445 = vmatprep.subr.mxu0 %v1789_v51 }
 0x10b   :  { %1411 = vmatpush3.msra.mxu1 %v1993_v3  ;;  %1446 = vmatpush3.msra.mxu0 %v1993_v3 }
 0x10c   :  { %1412 = vmatprep.subr.mxu1 %v1789_v51  ;;  %1447 = vmatprep.subr.mxu0 %v1789_v51 }
 0x10d   :  { %1413 = vmatpush3.msra.mxu1 %v1987_v0  ;;  %1448 = vmatpush3.msra.mxu0 %v1987_v0 }
 0x10e   :  { %1414 = vmatprep.subr.mxu1 %v1789_v51  ;;  %1449 = vmatprep.subr.mxu0 %v1789_v51 }
 0x10f   :  { %1415 = vmatpush3.msra.mxu1 %v1989_v1  ;;  %1450 = vmatpush3.msra.mxu0 %v1989_v1 }
 0x110   :  { %1416 = vmatprep.subr.mxu1 %v1789_v51  ;;  %1451 = vmatprep.subr.mxu0 %v1789_v51 }
 0x111   :  { %1417 = vmatpush3.msra.mxu1 %v1983_v62  ;;  %1452 = vmatpush3.msra.mxu0 %v1983_v62 }
 0x112   :  { %1418 = vmatprep.subr.mxu1 %v1789_v51  ;;  %1453 = vmatprep.subr.mxu0 %v1789_v51 }
 0x113   :  { %1419 = vmatpush3.msra.mxu1 %v1985_v63  ;;  %1454 = vmatpush3.msra.mxu0 %v1985_v63 }
 0x114   :  { %1420 = vmatprep.subr.mxu1 %v1789_v51  ;;  %1455 = vmatprep.subr.mxu0 %v1789_v51 }
 0x115   :  { %1421 = vmatpush3.msra.mxu1 %v1979_v59  ;;  %1456 = vmatpush3.msra.mxu0 %v1979_v59 }
 0x116   :  { %1422 = vmatprep.subr.mxu1 %v1789_v51  ;;  %1457 = vmatprep.subr.mxu0 %v1789_v51 }
 0x117   :  { %1423 = vmatpush3.msra.mxu1 %v1981_v61  ;;  %1458 = vmatpush3.msra.mxu0 %v1981_v61 }
 0x118   :  { %1424 = vmatprep.subr.mxu1 %v1789_v51  ;;  %1459 = vmatprep.subr.mxu0 %v1789_v51 }
 0x119   :  { %1425 = vmatpush3.msra.mxu1 %v1975_v56  ;;  %1460 = vmatpush3.msra.mxu0 %v1975_v56 }
 0x11a   :  { %1426 = vmatprep.subr.mxu1 %v1789_v51  ;;  %1461 = vmatprep.subr.mxu0 %v1789_v51 }
 0x11b   :  { %1427 = vmatpush3.msra.mxu1 %v1977_v58  ;;  %1462 = vmatpush3.msra.mxu0 %v1977_v58 }
 0x11c   :  { %1428 = vmatprep.subr.mxu1 %v1789_v51  ;;  %1463 = vmatprep.subr.mxu0 %v1789_v51 }
 0x11d   :  { %1429 = vmatpush3.msra.mxu1 %v1971_v54  ;;  %1464 = vmatpush3.msra.mxu0 %v1971_v54 }
 0x11e   :  { %1430 = vmatprep.subr.mxu1 %v1789_v51  ;;  %1465 = vmatprep.subr.mxu0 %v1789_v51 }
 0x11f   :  { %1431 = vmatpush3.msra.mxu1 %v1973_v55  ;;  %1466 = vmatpush3.msra.mxu0 %v1973_v55 }
 0x120   :  { %1433 = vmatmul.mubr.f32.vlgmr.msra.gmra.mxu1 %v1728_v15  ;;  %1470 = vmatprep.subr.mxu1 %v1789_v51 }
 0x121   :  { %1471 = vmatpush3.msra.mxu1 %v1999_v7  ;;  %1505 = vmatprep.subr.mxu0 %v1789_v51 }
 0x122   :  { %1472 = vmatprep.subr.mxu1 %v1789_v51  ;;  %1502 = vmatprep.mubr.msk.f32.mxu1 %vm1790_vm1, %v1789_v51 }
 0x123   :  { %1473 = vmatpush3.msra.mxu1 %v2003_v9 }
 0x124   :  { %1474 = vmatprep.subr.mxu1 %v1789_v51 }
 0x125   :  { %1475 = vmatpush3.msra.mxu1 %v1995_v4 }
 0x126   :  { %1476 = vmatprep.subr.mxu1 %v1789_v51 }
 0x127   :  { %1477 = vmatpush3.msra.mxu1 %v1997_v6 }
 0x128   :  { %1478 = vmatprep.subr.mxu1 %v1789_v51 }
 0x129   :  { %1479 = vmatpush3.msra.mxu1 %v1991_v2 }
 0x12a   :  { %1480 = vmatprep.subr.mxu1 %v1789_v51 }
 0x12b   :  { %1481 = vmatpush3.msra.mxu1 %v1993_v3 }
 0x12c   :  { %1482 = vmatprep.subr.mxu1 %v1789_v51 }
 0x12d   :  { %1483 = vmatpush3.msra.mxu1 %v1987_v0 }
 0x12e   :  { %1484 = vmatprep.subr.mxu1 %v1789_v51 }
 0x12f   :  { %1485 = vmatpush3.msra.mxu1 %v1989_v1 }
 0x130   :  { %1486 = vmatprep.subr.mxu1 %v1789_v51 }
 0x131   :  { %1487 = vmatpush3.msra.mxu1 %v1983_v62 }
 0x132   :  { %1488 = vmatprep.subr.mxu1 %v1789_v51 }
 0x133   :  { %1489 = vmatpush3.msra.mxu1 %v1985_v63 }
 0x134   :  { %1490 = vmatprep.subr.mxu1 %v1789_v51 }
 0x135   :  { %1491 = vmatpush3.msra.mxu1 %v1979_v59 }
 0x136   :  { %1492 = vmatprep.subr.mxu1 %v1789_v51 }
 0x137   :  { %1493 = vmatpush3.msra.mxu1 %v1981_v61 }
 0x138   :  { %1494 = vmatprep.subr.mxu1 %v1789_v51 }
 0x139   :  { %1495 = vmatpush3.msra.mxu1 %v1975_v56 }
 0x13a   :  { %1496 = vmatprep.subr.mxu1 %v1789_v51 }
 0x13b   :  { %1497 = vmatpush3.msra.mxu1 %v1977_v58 }
 0x13c   :  { %1498 = vmatprep.subr.mxu1 %v1789_v51 }
 0x13d   :  { %1499 = vmatpush3.msra.mxu1 %v1971_v54 }
 0x13e   :  { %1500 = vmatprep.subr.mxu1 %v1789_v51 }
 0x13f   :  { %1501 = vmatpush3.msra.mxu1 %v1973_v55 }
 0x140   :  { %1540 = vmatprep.subr.mxu1 %v1789_v51 }
 0x1e0   :  { %v468_v41 = vpop.f32.mrf.mxu1 }
 0x1e1   :  { %v485_v42 = vmul.f32 %v2126_v37, %v468_v41  ;;  %v261_v41 = vld [vmem:[%s2406_s6 + $0x40] sm:$0xff] }
 0x1e2   :  { %v1434_v43 = vpop.f32.mrf.mxu1 }
 0x1e3   :  { %v486_v45 = vadd.f32 %v485_v42, %v478_v40  ;;  %v260_v43 = vld [vmem:[%s2406_s6 + $0x38] sm:$0xff] }
 0x1e5   :  { %v487_v46 = vadd.f32 %v486_v45, %v2131_v44 }
 0x1e7   :  { %488 = vst [vmem:[#allocation3] sm:$0x3] %v487_v46  ;;  %1731 = vtanh.f32 %v487_v46  ;;  %v560_v49 = vmul.f32 %v487_v46, %v2120_v34 }
 0x1f4   :  { %v1732_v47 = vpop.eup %1731 }
 0x1f5   :  { %1468 = vmatmul.mubr.f32.vlgmr.msra.gmra.mxu0 %v1732_v47 }
 0x1f6   :  { %1506 = vmatpush3.msra.mxu0 %v1999_v7  ;;  %1537 = vmatprep.mubr.msk.f32.mxu0 %vm1790_vm1, %v1789_v51 }
 0x1f7   :  { %1507 = vmatprep.subr.mxu0 %v1789_v51 }
 0x1f8   :  { %1508 = vmatpush3.msra.mxu0 %v2003_v9 }
 0x1f9   :  { %1509 = vmatprep.subr.mxu0 %v1789_v51 }
 0x1fa   :  { %1510 = vmatpush3.msra.mxu0 %v1995_v4 }
 0x1fb   :  { %1511 = vmatprep.subr.mxu0 %v1789_v51 }
 0x1fc   :  { %1512 = vmatpush3.msra.mxu0 %v1997_v6 }
 0x1fd   :  { %1513 = vmatprep.subr.mxu0 %v1789_v51 }
 0x1fe   :  { %1514 = vmatpush3.msra.mxu0 %v1991_v2 }
 0x1ff   :  { %1515 = vmatprep.subr.mxu0 %v1789_v51 }
 0x200   :  { %1516 = vmatpush3.msra.mxu0 %v1993_v3 }
 0x201   :  { %1517 = vmatprep.subr.mxu0 %v1789_v51 }
 0x202   :  { %1518 = vmatpush3.msra.mxu0 %v1987_v0 }
 0x203   :  { %1519 = vmatprep.subr.mxu0 %v1789_v51 }
 0x204   :  { %1520 = vmatpush3.msra.mxu0 %v1989_v1 }
 0x205   :  { %1521 = vmatprep.subr.mxu0 %v1789_v51 }
 0x206   :  { %1522 = vmatpush3.msra.mxu0 %v1983_v62 }
 0x207   :  { %1523 = vmatprep.subr.mxu0 %v1789_v51 }
 0x208   :  { %1524 = vmatpush3.msra.mxu0 %v1985_v63 }
 0x209   :  { %1525 = vmatprep.subr.mxu0 %v1789_v51 }
 0x20a   :  { %1526 = vmatpush3.msra.mxu0 %v1979_v59 }
 0x20b   :  { %1527 = vmatprep.subr.mxu0 %v1789_v51 }
 0x20c   :  { %1528 = vmatpush3.msra.mxu0 %v1981_v61 }
 0x20d   :  { %1529 = vmatprep.subr.mxu0 %v1789_v51 }
 0x20e   :  { %1530 = vmatpush3.msra.mxu0 %v1975_v56 }
 0x20f   :  { %1531 = vmatprep.subr.mxu0 %v1789_v51 }
 0x210   :  { %1532 = vmatpush3.msra.mxu0 %v1977_v58 }
 0x211   :  { %1533 = vmatprep.subr.mxu0 %v1789_v51 }
 0x212   :  { %1534 = vmatpush3.msra.mxu0 %v1971_v54 }
 0x213   :  { %1535 = vmatprep.subr.mxu0 %v1789_v51 }
 0x214   :  { %1536 = vmatpush3.msra.mxu0 %v1973_v55 }
 0x215   :  { %1575 = vmatprep.subr.mxu0 %v1789_v51 }
 0x2b5   :  { %v556_v48 = vpop.f32.mrf.mxu0 }
 0x2b6   :  { %v561_v50 = vmul.f32 %v556_v48, %v2126_v37 }
 0x2b7   :  { %v1469_v52 = vpop.f32.mrf.mxu0 }
 0x2b8   :  { %v562_v53 = vadd.f32 %v561_v50, %v560_v49  ;;  %v953_v52 = vrot.slane %v2117_v32, 4 }
 0x2ba   :  { %v566_v60 = vadd.f32 %v564_v57, %v562_v53 }
 0x2bc   :  { %567 = vst [vmem:[#allocation3 + $0x2] sm:$0x3] %v566_v60  ;;  %1733 = vtanh.f32 %v566_v60  ;;  %v639_v10 = vmul.f32 %v566_v60, %v2120_v34  ;;  %v259_v60 = vld [vmem:[%s2406_s6 + $0x30] sm:$0xff] }
 0x2c9   :  { %v1734_v5 = vpop.eup %1733 }
 0x2ca   :  { %1503 = vmatmul.mubr.f32.vlgmr.msra.gmra.mxu1 %v1734_v5 }
 0x2cb   :  { %1541 = vmatpush3.msra.mxu1 %v1999_v7  ;;  %1572 = vmatprep.mubr.msk.f32.mxu1 %vm1790_vm1, %v1789_v51 }
 0x2cc   :  { %1542 = vmatprep.subr.mxu1 %v1789_v51 }
 0x2cd   :  { %1543 = vmatpush3.msra.mxu1 %v2003_v9 }
 0x2ce   :  { %1544 = vmatprep.subr.mxu1 %v1789_v51 }
 0x2cf   :  { %1545 = vmatpush3.msra.mxu1 %v1995_v4 }
 0x2d0   :  { %1546 = vmatprep.subr.mxu1 %v1789_v51 }
 0x2d1   :  { %1547 = vmatpush3.msra.mxu1 %v1997_v6 }
 0x2d2   :  { %1548 = vmatprep.subr.mxu1 %v1789_v51 }
 0x2d3   :  { %1549 = vmatpush3.msra.mxu1 %v1991_v2 }
 0x2d4   :  { %1550 = vmatprep.subr.mxu1 %v1789_v51 }
 0x2d5   :  { %1551 = vmatpush3.msra.mxu1 %v1993_v3 }
 0x2d6   :  { %1552 = vmatprep.subr.mxu1 %v1789_v51 }
 0x2d7   :  { %1553 = vmatpush3.msra.mxu1 %v1987_v0 }
 0x2d8   :  { %1554 = vmatprep.subr.mxu1 %v1789_v51 }
 0x2d9   :  { %1555 = vmatpush3.msra.mxu1 %v1989_v1 }
 0x2da   :  { %1556 = vmatprep.subr.mxu1 %v1789_v51 }
 0x2db   :  { %1557 = vmatpush3.msra.mxu1 %v1983_v62 }
 0x2dc   :  { %1558 = vmatprep.subr.mxu1 %v1789_v51 }
 0x2dd   :  { %1559 = vmatpush3.msra.mxu1 %v1985_v63 }
 0x2de   :  { %1560 = vmatprep.subr.mxu1 %v1789_v51 }
 0x2df   :  { %1561 = vmatpush3.msra.mxu1 %v1979_v59 }
 0x2e0   :  { %1562 = vmatprep.subr.mxu1 %v1789_v51 }
 0x2e1   :  { %1563 = vmatpush3.msra.mxu1 %v1981_v61 }
 0x2e2   :  { %1564 = vmatprep.subr.mxu1 %v1789_v51 }
 0x2e3   :  { %1565 = vmatpush3.msra.mxu1 %v1975_v56 }
 0x2e4   :  { %1566 = vmatprep.subr.mxu1 %v1789_v51 }
 0x2e5   :  { %1567 = vmatpush3.msra.mxu1 %v1977_v58 }
 0x2e6   :  { %1568 = vmatprep.subr.mxu1 %v1789_v51 }
 0x2e7   :  { %1569 = vmatpush3.msra.mxu1 %v1971_v54 }
 0x2e8   :  { %1570 = vmatprep.subr.mxu1 %v1789_v51 }
 0x2e9   :  { %1571 = vmatpush3.msra.mxu1 %v1973_v55 }
 0x2ea   :  { %1610 = vmatprep.subr.mxu1 %v1789_v51 }
 0x38a   :  { %v635_v8 = vpop.f32.mrf.mxu1 }
 0x38b   :  { %v640_v11 = vmul.f32 %v635_v8, %v2126_v37  ;;  %v258_v8 = vld [vmem:[%s2406_s6 + $0x28] sm:$0xff] }
 0x38c   :  { %v1504_v12 = vpop.f32.mrf.mxu1 }
 0x38d   :  { %v641_v13 = vadd.f32 %v640_v11, %v639_v10  ;;  %v257_v11 = vld [vmem:[%s2406_s6 + $0x20] sm:$0xff] }
 0x38f   :  { %v644_v15 = vadd.f32 %v642_v14, %v641_v13  ;;  %v256_v13 = vld [vmem:[%s2406_s6 + $0x18] sm:$0xff] }
 0x391   :  { %645 = vst [vmem:[#allocation3 + $0x4] sm:$0x3] %v644_v15  ;;  %1735 = vtanh.f32 %v644_v15  ;;  %v717_v18 = vmul.f32 %v644_v15, %v2120_v34  ;;  %v255_v15 = vld [vmem:[%s2406_s6 + $0x10] sm:$0xff] }
 0x39e   :  { %v1736_v16 = vpop.eup %1735 }
 0x39f   :  { %1538 = vmatmul.mubr.f32.vlgmr.msra.gmra.mxu0 %v1736_v16  ;;  %v254_v16 = vld [vmem:[%s2406_s6 + $0x8] sm:$0xff] }
 0x3a0   :  { %1576 = vmatpush3.msra.mxu0 %v1999_v7  ;;  %1607 = vmatprep.mubr.msk.f32.mxu0 %vm1790_vm1, %v1789_v51 }
 0x3a1   :  { %1577 = vmatprep.subr.mxu0 %v1789_v51 }
 0x3a2   :  { %1578 = vmatpush3.msra.mxu0 %v2003_v9 }
 0x3a3   :  { %1579 = vmatprep.subr.mxu0 %v1789_v51 }
 0x3a4   :  { %1580 = vmatpush3.msra.mxu0 %v1995_v4 }
 0x3a5   :  { %1581 = vmatprep.subr.mxu0 %v1789_v51 }
 0x3a6   :  { %1582 = vmatpush3.msra.mxu0 %v1997_v6 }
 0x3a7   :  { %1583 = vmatprep.subr.mxu0 %v1789_v51 }
 0x3a8   :  { %1584 = vmatpush3.msra.mxu0 %v1991_v2 }
 0x3a9   :  { %1585 = vmatprep.subr.mxu0 %v1789_v51 }
 0x3aa   :  { %1586 = vmatpush3.msra.mxu0 %v1993_v3 }
 0x3ab   :  { %1587 = vmatprep.subr.mxu0 %v1789_v51 }
 0x3ac   :  { %1588 = vmatpush3.msra.mxu0 %v1987_v0 }
 0x3ad   :  { %1589 = vmatprep.subr.mxu0 %v1789_v51 }
 0x3ae   :  { %1590 = vmatpush3.msra.mxu0 %v1989_v1 }
 0x3af   :  { %1591 = vmatprep.subr.mxu0 %v1789_v51 }
 0x3b0   :  { %1592 = vmatpush3.msra.mxu0 %v1983_v62 }
 0x3b1   :  { %1593 = vmatprep.subr.mxu0 %v1789_v51 }
 0x3b2   :  { %1594 = vmatpush3.msra.mxu0 %v1985_v63 }
 0x3b3   :  { %1595 = vmatprep.subr.mxu0 %v1789_v51 }
 0x3b4   :  { %1596 = vmatpush3.msra.mxu0 %v1979_v59 }
 0x3b5   :  { %1597 = vmatprep.subr.mxu0 %v1789_v51 }
 0x3b6   :  { %1598 = vmatpush3.msra.mxu0 %v1981_v61 }
 0x3b7   :  { %1599 = vmatprep.subr.mxu0 %v1789_v51 }
 0x3b8   :  { %1600 = vmatpush3.msra.mxu0 %v1975_v56 }
 0x3b9   :  { %1601 = vmatprep.subr.mxu0 %v1789_v51 }
 0x3ba   :  { %1602 = vmatpush3.msra.mxu0 %v1977_v58 }
 0x3bb   :  { %1603 = vmatprep.subr.mxu0 %v1789_v51 }
 0x3bc   :  { %1604 = vmatpush3.msra.mxu0 %v1971_v54 }
 0x3bd   :  { %1605 = vmatprep.subr.mxu0 %v1789_v51 }
 0x3be   :  { %1606 = vmatpush3.msra.mxu0 %v1973_v55 }
 0x3bf   :  { %1645 = vmatprep.subr.mxu0 %v1789_v51 }
 0x45f   :  { %v713_v17 = vpop.f32.mrf.mxu0 }
 0x460   :  { %v718_v19 = vmul.f32 %v713_v17, %v2126_v37  ;;  %v253_v17 = vld [vmem:[%s2406_s6] sm:$0xff] }
 0x461   :  { %v1539_v20 = vpop.f32.mrf.mxu0 }
 0x462   :  { %v719_v21 = vadd.f32 %v718_v19, %v717_v18 }
 0x464   :  { %v722_v23 = vadd.f32 %v720_v22, %v719_v21 }
 0x466   :  { %723 = vst [vmem:[#allocation3 + $0x6] sm:$0x3] %v722_v23  ;;  %1737 = vtanh.f32 %v722_v23  ;;  %v795_v26 = vmul.f32 %v722_v23, %v2120_v34 }
 0x473   :  { %v1738_v24 = vpop.eup %1737 }
 0x474   :  { %1573 = vmatmul.mubr.f32.vlgmr.msra.gmra.mxu1 %v1738_v24 }
 0x475   :  { %1611 = vmatpush3.msra.mxu1 %v1999_v7  ;;  %1642 = vmatprep.mubr.msk.f32.mxu1 %vm1790_vm1, %v1789_v51 }
 0x476   :  { %1612 = vmatprep.subr.mxu1 %v1789_v51 }
 0x477   :  { %1613 = vmatpush3.msra.mxu1 %v2003_v9 }
 0x478   :  { %1614 = vmatprep.subr.mxu1 %v1789_v51 }
 0x479   :  { %1615 = vmatpush3.msra.mxu1 %v1995_v4 }
 0x47a   :  { %1616 = vmatprep.subr.mxu1 %v1789_v51 }
 0x47b   :  { %1617 = vmatpush3.msra.mxu1 %v1997_v6 }
 0x47c   :  { %1618 = vmatprep.subr.mxu1 %v1789_v51 }
 0x47d   :  { %1619 = vmatpush3.msra.mxu1 %v1991_v2 }
 0x47e   :  { %1620 = vmatprep.subr.mxu1 %v1789_v51 }
 0x47f   :  { %1621 = vmatpush3.msra.mxu1 %v1993_v3 }
 0x480   :  { %1622 = vmatprep.subr.mxu1 %v1789_v51 }
 0x481   :  { %1623 = vmatpush3.msra.mxu1 %v1987_v0 }
 0x482   :  { %1624 = vmatprep.subr.mxu1 %v1789_v51 }
 0x483   :  { %1625 = vmatpush3.msra.mxu1 %v1989_v1 }
 0x484   :  { %1626 = vmatprep.subr.mxu1 %v1789_v51 }
 0x485   :  { %1627 = vmatpush3.msra.mxu1 %v1983_v62 }
 0x486   :  { %1628 = vmatprep.subr.mxu1 %v1789_v51 }
 0x487   :  { %1629 = vmatpush3.msra.mxu1 %v1985_v63 }
 0x488   :  { %1630 = vmatprep.subr.mxu1 %v1789_v51 }
 0x489   :  { %1631 = vmatpush3.msra.mxu1 %v1979_v59 }
 0x48a   :  { %1632 = vmatprep.subr.mxu1 %v1789_v51 }
 0x48b   :  { %1633 = vmatpush3.msra.mxu1 %v1981_v61 }
 0x48c   :  { %1634 = vmatprep.subr.mxu1 %v1789_v51 }
 0x48d   :  { %1635 = vmatpush3.msra.mxu1 %v1975_v56 }
 0x48e   :  { %1636 = vmatprep.subr.mxu1 %v1789_v51 }
 0x48f   :  { %1637 = vmatpush3.msra.mxu1 %v1977_v58 }
 0x490   :  { %1638 = vmatprep.subr.mxu1 %v1789_v51 }
 0x491   :  { %1639 = vmatpush3.msra.mxu1 %v1971_v54 }
 0x492   :  { %1640 = vmatprep.subr.mxu1 %v1789_v51 }
 0x493   :  { %1641 = vmatpush3.msra.mxu1 %v1973_v55 }
 0x534   :  { %v791_v25 = vpop.f32.mrf.mxu1 }
 0x535   :  { %v796_v27 = vmul.f32 %v791_v25, %v2126_v37 }
 0x536   :  { %v1574_v28 = vpop.f32.mrf.mxu1 }
 0x537   :  { %v797_v29 = vadd.f32 %v796_v27, %v795_v26  ;;  %v1031_v26 = vrot.slane %v2117_v32, 6 }
 0x539   :  { %v798_v30 = vadd.f32 %v797_v29, %v2117_v32 }
 0x53b   :  { %799 = vst [vmem:[#allocation3 + $0x8] sm:$0x3] %v798_v30  ;;  %1739 = vtanh.f32 %v798_v30 }
 0x548   :  { %v1740_v31 = vpop.eup %1739 }
 0x549   :  { %1608 = vmatmul.mubr.f32.vlgmr.msra.gmra.mxu0 %v1740_v31 }
 0x54a   :  { %1646 = vmatpush3.msra.mxu0 %v1999_v7  ;;  %1677 = vmatprep.mubr.msk.f32.mxu0 %vm1790_vm1, %v1789_v51  ;;  %v265_v7 = vld [vmem:[%s2406_s6 + $0x60] sm:$0xff] }
 0x54b   :  { %1647 = vmatprep.subr.mxu0 %v1789_v51 }
 0x54c   :  { %1648 = vmatpush3.msra.mxu0 %v2003_v9 }
 0x54d   :  { %1649 = vmatprep.subr.mxu0 %v1789_v51 }
 0x54e   :  { %1650 = vmatpush3.msra.mxu0 %v1995_v4 }
 0x54f   :  { %1651 = vmatprep.subr.mxu0 %v1789_v51 }
 0x550   :  { %1652 = vmatpush3.msra.mxu0 %v1997_v6  ;;  %v266_v6 = vld [vmem:[%s2406_s6 + $0x68] sm:$0xff] }
 0x551   :  { %1653 = vmatprep.subr.mxu0 %v1789_v51 }
 0x552   :  { %1654 = vmatpush3.msra.mxu0 %v1991_v2  ;;  %v1035_v2 = vld [vmem:[#allocation3] sm:$0xff] }
 0x553   :  { %1655 = vmatprep.subr.mxu0 %v1789_v51 }
 0x554   :  { %1656 = vmatpush3.msra.mxu0 %v1993_v3 }
 0x555   :  { %1657 = vmatprep.subr.mxu0 %v1789_v51 }
 0x556   :  { %1658 = vmatpush3.msra.mxu0 %v1987_v0 }
 0x557   :  { %1659 = vmatprep.subr.mxu0 %v1789_v51 }
 0x558   :  { %1660 = vmatpush3.msra.mxu0 %v1989_v1 }
 0x559   :  { %1661 = vmatprep.subr.mxu0 %v1789_v51 }
 0x55a   :  { %1662 = vmatpush3.msra.mxu0 %v1983_v62  ;;  %v871_v62 = vmul.f32 %v798_v30, %v2120_v34 }
 0x55b   :  { %1663 = vmatprep.subr.mxu0 %v1789_v51 }
 0x55c   :  { %1664 = vmatpush3.msra.mxu0 %v1985_v63 }
 0x55d   :  { %1665 = vmatprep.subr.mxu0 %v1789_v51 }
 0x55e   :  { %1666 = vmatpush3.msra.mxu0 %v1979_v59 }
 0x55f   :  { %1667 = vmatprep.subr.mxu0 %v1789_v51 }
 0x560   :  { %1668 = vmatpush3.msra.mxu0 %v1981_v61 }
 0x561   :  { %1669 = vmatprep.subr.mxu0 %v1789_v51 }
 0x562   :  { %1670 = vmatpush3.msra.mxu0 %v1975_v56  ;;  %v875_v56 = vrot.slane %v2117_v32, 2 }
 0x563   :  { %1671 = vmatprep.subr.mxu0 %v1789_v51 }
 0x564   :  { %1672 = vmatpush3.msra.mxu0 %v1977_v58 }
 0x565   :  { %1673 = vmatprep.subr.mxu0 %v1789_v51 }
 0x566   :  { %1674 = vmatpush3.msra.mxu0 %v1971_v54  ;;  %v2323_v54 = vld [vmem:[%s2409_s9] ss:$0 sm:$0xff] }
 0x567   :  { %1675 = vmatprep.subr.mxu0 %v1789_v51  ;;  %v268_v51 = vld [vmem:[%s2406_s6 + $0x78] sm:$0xff]  ;;  %v289_v9 = vmul.f32 %v2323_v54, %v266_v6  ;;  %v288_v35 = vmul.f32 %v2323_v54, %v265_v7  ;;  %v287_v38 = vmul.f32 %v2323_v54, %v264_v33  ;;  %v286_v40 = vmul.f32 %v2323_v54, %v263_v36 }
 0x568   :  { %1676 = vmatpush3.msra.mxu0 %v1973_v55  ;;  %v267_v55 = vld [vmem:[%s2406_s6 + $0x70] sm:$0xff]  ;;  %v291_v3 = vmul.f32 %v2323_v54, %v268_v51  ;;  %v285_v42 = vmul.f32 %v2323_v54, %v262_v39  ;;  %v284_v44 = vmul.f32 %v2323_v54, %v261_v41  ;;  %v283_v45 = vmul.f32 %v2323_v54, %v260_v43  ;;  %s1791_s6 = smov [#allocation3]  }
 0x569   :  { %v290_v4 = vmul.f32 %v2323_v54, %v267_v55  ;;  %v282_v5 = vmul.f32 %v2323_v54, %v259_v60  ;;  %v281_v10 = vmul.f32 %v2323_v54, %v258_v8  ;;  %v280_v12 = vmul.f32 %v2323_v54, %v257_v11  ;;  %s1119_s17 = sshll.u32 %s1791_s6, 4  ;;  %s1120_s17 = int_to_ptr.vmem [resolvable:$true] %s1119_s17 }
 0x56a   :  { %1680 = vmatprep.subr.mxu1 %v291_v3  ;;  %v279_v14 = vmul.f32 %v2323_v54, %v256_v13  ;;  %v278_v18 = vmul.f32 %v2323_v54, %v255_v15  ;;  %v277_v19 = vmul.f32 %v2323_v54, %v254_v16  ;;  %v276_v20 = vmul.f32 %v2323_v54, %v253_v17  ;;  %s1745_s18 = scalar_lea.vmem %s1120_s17, 256  ;;  %p1750_p1 = scmp.lt.s32.totalorder %s1120_s17, %s1120_s17 }
 0x56b   :  { %p1746_p0 = scmp.ne.s32.totalorder %s1120_s17, %s1745_s18  ;;  %p1751_p2 = scmp.lt.s32.totalorder %s1745_s18, %s1745_s18 }
 0x56d   :  { %p1752_p3 = por %p1751_p2, %p1750_p1 }
 0x56f   :  { %p1753_p4 = pnand %p1752_p3, %p1746_p0 }
 0x609   :  { %v867_v59 = vpop.f32.mrf.mxu0 }
 0x60a   :  { %v872_v61 = vmul.f32 %v867_v59, %v2126_v37 }
 0x60b   :  { %v1609_v63 = vpop.f32.mrf.mxu0 }
 0x60c   :  { %v873_v0 = vadd.f32 %v872_v61, %v871_v62 }
 0x60e   :  { %v877_v1 = vadd.f32 %v875_v56, %v873_v0 }
 0x610   :  { %878 = vst [vmem:[#allocation3 + $0xa] sm:$0x3] %v877_v1  ;;  %1741 = vtanh.f32 %v877_v1  ;;  %v950_v47 = vmul.f32 %v877_v1, %v2120_v34 }
 0x61d   :  { %v1742_v58 = vpop.eup %1741 }
 0x61e   :  { %1643 = vmatmul.mubr.f32.vlgmr.msra.gmra.mxu1 %v1742_v58 }
 0x61f   :  { %1712 = vmatprep.mubr.f32.mxu1 %v1035_v2  ;;  %1681 = vmatpush3.msra.mxu1 %v291_v3 }
 0x620   :  { %1682 = vmatprep.subr.mxu1 %v290_v4 }
 0x621   :  { %1683 = vmatpush3.msra.mxu1 %v290_v4 }
 0x622   :  { %1684 = vmatprep.subr.mxu1 %v289_v9 }
 0x623   :  { %1685 = vmatpush3.msra.mxu1 %v289_v9 }
 0x624   :  { %1686 = vmatprep.subr.mxu1 %v288_v35 }
 0x625   :  { %1687 = vmatpush3.msra.mxu1 %v288_v35 }
 0x626   :  { %1688 = vmatprep.subr.mxu1 %v287_v38 }
 0x627   :  { %1689 = vmatpush3.msra.mxu1 %v287_v38 }
 0x628   :  { %1690 = vmatprep.subr.mxu1 %v286_v40 }
 0x629   :  { %1691 = vmatpush3.msra.mxu1 %v286_v40 }
 0x62a   :  { %1692 = vmatprep.subr.mxu1 %v285_v42 }
 0x62b   :  { %1693 = vmatpush3.msra.mxu1 %v285_v42 }
 0x62c   :  { %1694 = vmatprep.subr.mxu1 %v284_v44 }
 0x62d   :  { %1695 = vmatpush3.msra.mxu1 %v284_v44 }
 0x62e   :  { %1696 = vmatprep.subr.mxu1 %v283_v45 }
 0x62f   :  { %1697 = vmatpush3.msra.mxu1 %v283_v45 }
 0x630   :  { %1698 = vmatprep.subr.mxu1 %v282_v5 }
 0x631   :  { %1699 = vmatpush3.msra.mxu1 %v282_v5 }
 0x632   :  { %1700 = vmatprep.subr.mxu1 %v281_v10 }
 0x633   :  { %1701 = vmatpush3.msra.mxu1 %v281_v10 }
 0x634   :  { %1702 = vmatprep.subr.mxu1 %v280_v12 }
 0x635   :  { %1703 = vmatpush3.msra.mxu1 %v280_v12 }
 0x636   :  { %1704 = vmatprep.subr.mxu1 %v279_v14 }
 0x637   :  { %1705 = vmatpush3.msra.mxu1 %v279_v14 }
 0x638   :  { %1706 = vmatprep.subr.mxu1 %v278_v18 }
 0x639   :  { %1707 = vmatpush3.msra.mxu1 %v278_v18 }
 0x63a   :  { %1708 = vmatprep.subr.mxu1 %v277_v19 }
 0x63b   :  { %1709 = vmatpush3.msra.mxu1 %v277_v19 }
 0x63c   :  { %1710 = vmatprep.subr.mxu1 %v276_v20 }
 0x63d   :  { %1711 = vmatpush3.msra.mxu1 %v276_v20 }
 0x6de   :  { %v946_v46 = vpop.f32.mrf.mxu1 }
 0x6df   :  { %v951_v48 = vmul.f32 %v946_v46, %v2126_v37 }
 0x6e0   :  { %v1644_v49 = vpop.f32.mrf.mxu1 }
 0x6e1   :  { %v952_v50 = vadd.f32 %v951_v48, %v950_v47 }
 0x6e3   :  { %v955_v53 = vadd.f32 %v953_v52, %v952_v50 }
 0x6e5   :  { %956 = vst [vmem:[#allocation3 + $0xc] sm:$0x3] %v955_v53  ;;  %1743 = vtanh.f32 %v955_v53  ;;  %v1028_v22 = vmul.f32 %v955_v53, %v2120_v34 }
 0x6f2   :  { %v1744_v57 = vpop.eup %1743 }
 0x6f3   :  { %1678 = vmatmul.mubr.f32.vlgmr.msra.gmra.mxu0 %v1744_v57 }
 0x7b3   :  { %v1024_v21 = vpop.f32.mrf.mxu0 }
 0x7b4   :  { %v1029_v23 = vmul.f32 %v1024_v21, %v2126_v37 }
 0x7b5   :  { %v1679_v24 = vpop.f32.mrf.mxu0 }
 0x7b6   :  { %v1030_v25 = vadd.f32 %v1029_v23, %v1028_v22 }
 0x7b8   :  { %v1033_v27 = vadd.f32 %v1031_v26, %v1030_v25 }
 0x7ba   :  { %1034 = vst [vmem:[#allocation3 + $0xe] sm:$0x3] %v1033_v27 }
 0x7c1   :  { %v1036_v28 = vld [vmem:[#allocation3 + $0x8] sm:$0xff] }
 0x7c2   :  { %1713 = vmatmul.mubr.f32.vlgmr.msra.gmra.mxu1 %v1036_v28 }
 0x7c3   :  { %1756 = shalt.err (!%p1753_p4)
}
 0x7c4   :  { %s1792_s19 = smov 128   ;;  %s1793_s20 = smov 8  }
 0x7c5   :  { %1125 = dma.vmem_to_hbm [thread:$0]  %s1120_s17, 256, %s2410_s10, [#allocation4], %s1792_s19, %s1792_s19, %s1793_s20  }
 0x7c6   :  { %s1794_s22 = smov [#allocation5]  }
 0x7c7   :  { %s1131_s23 = sshll.u32 %s1794_s22, 4  ;;  %s1132_s23 = int_to_ptr.vmem [resolvable:$true] %s1131_s23 }
 0x7c8   :  { %s1765_s24 = scalar_lea.vmem %s1132_s23, 256  ;;  %p1770_p6 = scmp.lt.s32.totalorder %s1132_s23, %s1132_s23 }
 0x7c9   :  { %p1766_p5 = scmp.ne.s32.totalorder %s1132_s23, %s1765_s24  ;;  %p1771_p7 = scmp.lt.s32.totalorder %s1765_s24, %s1765_s24 }
 0x7cb   :  { %p1772_p8 = por %p1771_p7, %p1770_p6 }
 0x7cd   :  { %p1773_p9 = pnand %p1772_p8, %p1766_p5 }
 0x882   :  { %v1714_v32 = vpop.f32.mrf.mxu1 }
 0x883   :  { %1113 = vst.msk [vmem:[#allocation5 + $0x8] sm:$0xff] %vm295_vm0, %v1714_v32 }
 0x884   :  { %v1103_v34 = vpop.f32.mrf.mxu1 }
 0x885   :  { %1112 = vst.msk [vmem:[#allocation5] sm:$0xff] %vm295_vm0, %v1103_v34 }
 0x886   :  { %1776 = shalt.err (!%p1773_p9)
}
 0x887   :  { %1137 = dma.vmem_to_hbm [thread:$0]  %s1132_s23, 256, %s2411_s11, [#allocation6], %s1792_s19, %s1792_s19, %s1793_s20  }
 0x888   :  { %1785 = dma.done.wait [#allocation4], 256  }
 0x889   :  { %1786 = vsyncadd [#allocation4], 4294967040 }
 0x88a   :  { %1787 = dma.done.wait [#allocation6], 256  }
 0x88b   :  { %1788 = vsyncadd [#allocation6], 4294967040 }
 0x88c   :  { %1144 = vsyncpa [#allocation4], 1 }
 0x88d   :  { %1145 = vsyncpa [#allocation6], 1 }

</bundles_post_ra>
